<compile_context>
chip_gen: v6e
topology: v6e:2x2x1
jax: 0.10.0
libtpu: 0.0.40
codegen_flags: <defaults>
</compile_context>

<pallas_src>
import math
from functools import partial

import jax
import jax.numpy as jnp
import numpy as np
from jax.experimental import pallas as pl
from jax.experimental.pallas import tpu as pltpu


def _attention_kernel(x_ref, enc_ref, wq_ref, wk_ref, wv_ref,
                      bq_ref, bk_ref, bv_ref, o_ref, *, scale):
    # x_ref:   [B, Sq, Din]   hidden_states
    # enc_ref: [B, Sk, Din]   encoder_hidden_states
    # w*_ref:  [Din, Dm]      pre-transposed linear weights (so y = x @ W)
    # b*_ref:  [1, Dm]        biases (2-D for friendly layout)
    # o_ref:   [B, Sq, Dm]    context_layer
    B, Sq, Din = x_ref.shape
    _, Sk, _ = enc_ref.shape
    Dm = wq_ref.shape[1]

    # Collapse batch+seq into the sublane axis for plain 2-D MXU matmuls.
    x2 = x_ref[...].reshape(B * Sq, Din)
    e2 = enc_ref[...].reshape(B * Sk, Din)

    q = (jnp.dot(x2, wq_ref[...], preferred_element_type=jnp.float32)
         + bq_ref[...]).reshape(B, Sq, Dm)
    k = (jnp.dot(e2, wk_ref[...], preferred_element_type=jnp.float32)
         + bk_ref[...]).reshape(B, Sk, Dm)
    v = (jnp.dot(e2, wv_ref[...], preferred_element_type=jnp.float32)
         + bv_ref[...]).reshape(B, Sk, Dm)

    # Scaled dot-product scores; contract the feature axis directly
    # (no explicit K transpose in the kernel).
    scores = jnp.einsum("bqd,bkd->bqk", q, k,
                        preferred_element_type=jnp.float32) * scale

    # Numerically stable softmax; normalization folded after the PV matmul.
    m = jnp.max(scores, axis=-1, keepdims=True)
    p = jnp.exp(scores - m)                       # un-normalized probabilities
    denom = jnp.sum(p, axis=-1, keepdims=True)    # [B, Sq, 1]

    ctx = jnp.einsum("bqk,bkd->bqd", p, v,
                     preferred_element_type=jnp.float32)
    o_ref[...] = (ctx / denom).astype(o_ref.dtype)


def attention_forward(hidden_states, encoder_hidden_states,
                      wq, bq, wk, bk, wv, bv, *, nhead):
    """Pallas implementation of Attention.forward.

    hidden_states:          [B, Sq, d_in]
    encoder_hidden_states:  [B, Sk, d_in]
    wq/wk/wv:               [d_model, d_in]   (PyTorch nn.Linear weight layout)
    bq/bk/bv:               [d_model]
    returns:                [B, Sq, d_model]
    """
    B, Sq, d_in = hidden_states.shape
    d_model = wq.shape[0]
    head_size = d_model // nhead
    scale = 1.0 / math.sqrt(head_size)

    # Wrapper-side layout plumbing (outside the kernel, one-time XLA ops):
    # pre-transpose weights to [d_in, d_model]; make biases 2-D.
    wq_t, wk_t, wv_t = wq.T, wk.T, wv.T
    bq2 = bq.reshape(1, d_model)
    bk2 = bk.reshape(1, d_model)
    bv2 = bv.reshape(1, d_model)

    kernel = partial(_attention_kernel, scale=scale)
    vmem = lambda: pl.BlockSpec(memory_space=pltpu.MemorySpace.VMEM)

    return pl.pallas_call(
        kernel,
        out_shape=jax.ShapeDtypeStruct((B, Sq, d_model), hidden_states.dtype),
        in_specs=[vmem() for _ in range(8)],
        out_specs=vmem(),
    )(hidden_states, encoder_hidden_states, wq_t, wk_t, wv_t, bq2, bk2, bv2)


def _reference(hidden_states, encoder_hidden_states, wq, bq, wk, bk, wv, bv, *, nhead):
    d_model = wq.shape[0]
    head_size = d_model // nhead
    Q = hidden_states @ wq.T + bq
    K = encoder_hidden_states @ wk.T + bk
    V = encoder_hidden_states @ wv.T + bv
    scores = jnp.einsum("bqd,bkd->bqk", Q, K) / math.sqrt(head_size)
    probs = jax.nn.softmax(scores, axis=-1)
    return jnp.einsum("bqk,bkd->bqd", probs, V)


if __name__ == "__main__":
    # Small shapes consistent with the module.
    B, S = 2, 8          # batch, seq (both decoder and encoder side)
    d_in = 32            # input feature dim
    d_model = 32         # projection dim
    nhead = 4            # only affects the 1/sqrt(d_model/nhead) scale
    # dropout=0.1 in __init__ is never applied in forward(); nothing to run.

    key = jax.random.PRNGKey(0)
    ks = jax.random.split(key, 8)

    hidden_states = jax.random.normal(ks[0], (B, S, d_in), dtype=jnp.float32)
    encoder_hidden_states = jax.random.normal(ks[1], (B, S, d_in), dtype=jnp.float32)

    # Deterministic nn.Linear-style init: U(-1/sqrt(d_in), 1/sqrt(d_in)).
    bound = 1.0 / math.sqrt(d_in)
    wq = jax.random.uniform(ks[2], (d_model, d_in), minval=-bound, maxval=bound)
    wk = jax.random.uniform(ks[3], (d_model, d_in), minval=-bound, maxval=bound)
    wv = jax.random.uniform(ks[4], (d_model, d_in), minval=-bound, maxval=bound)
    bq = jax.random.uniform(ks[5], (d_model,), minval=-bound, maxval=bound)
    bk = jax.random.uniform(ks[6], (d_model,), minval=-bound, maxval=bound)
    bv = jax.random.uniform(ks[7], (d_model,), minval=-bound, maxval=bound)

    out = attention_forward(hidden_states, encoder_hidden_states,
                            wq, bq, wk, bk, wv, bv, nhead=nhead)
    out = jax.block_until_ready(out)

    ref = _reference(hidden_states, encoder_hidden_states,
                     wq, bq, wk, bk, wv, bv, nhead=nhead)
    np.testing.assert_allclose(np.asarray(out), np.asarray(ref),
                               rtol=1e-5, atol=1e-5)

    print("KERNEL_OK")
</pallas_src>

<mosaic_0001>
module attributes {stable_mosaic.version = 11 : i64} {
  func.func @_attention_kernel(%arg0: memref<2x8x32xf32, #tpu.memory_space<vmem>>, %arg1: memref<2x8x32xf32, #tpu.memory_space<vmem>>, %arg2: memref<32x32xf32, #tpu.memory_space<vmem>>, %arg3: memref<32x32xf32, #tpu.memory_space<vmem>>, %arg4: memref<32x32xf32, #tpu.memory_space<vmem>>, %arg5: memref<1x32xf32, #tpu.memory_space<vmem>>, %arg6: memref<1x32xf32, #tpu.memory_space<vmem>>, %arg7: memref<1x32xf32, #tpu.memory_space<vmem>>, %arg8: memref<2x8x32xf32, #tpu.memory_space<vmem>>) attributes {dimension_semantics = [], scalar_prefetch = 0 : i64, scratch_operands = 0 : i64, tpu.core_type = #tpu.core_type<tc>} {
    %c0 = arith.constant 0 : index
    %c0_0 = arith.constant 0 : index
    %c0_1 = arith.constant 0 : index
    %0 = vector.load %arg0[%c0, %c0_0, %c0_1] : memref<2x8x32xf32, #tpu.memory_space<vmem>>, vector<2x8x32xf32>
    %1 = vector.shape_cast %0 : vector<2x8x32xf32> to vector<16x32xf32>
    %c0_2 = arith.constant 0 : index
    %c0_3 = arith.constant 0 : index
    %c0_4 = arith.constant 0 : index
    %2 = vector.load %arg1[%c0_2, %c0_3, %c0_4] : memref<2x8x32xf32, #tpu.memory_space<vmem>>, vector<2x8x32xf32>
    %3 = vector.shape_cast %2 : vector<2x8x32xf32> to vector<16x32xf32>
    %c0_5 = arith.constant 0 : index
    %c0_6 = arith.constant 0 : index
    %4 = vector.load %arg2[%c0_5, %c0_6] : memref<32x32xf32, #tpu.memory_space<vmem>>, vector<32x32xf32>
    %cst = arith.constant dense<0.000000e+00> : vector<16x32xf32>
    %5 = tpu.matmul %1, %4, %cst {dimension_numbers = #tpu.dot_dimension_numbers<[1], [0], [0], [1], [0, 0, 1, 1], [], []>} : vector<16x32xf32>, vector<32x32xf32>, vector<16x32xf32> -> vector<16x32xf32>
    %c0_7 = arith.constant 0 : index
    %c0_8 = arith.constant 0 : index
    %6 = vector.load %arg5[%c0_7, %c0_8] : memref<1x32xf32, #tpu.memory_space<vmem>>, vector<1x32xf32>
    %7 = vector.broadcast %6 : vector<1x32xf32> to vector<16x32xf32>
    %8 = arith.addf %5, %7 : vector<16x32xf32>
    %9 = vector.shape_cast %8 : vector<16x32xf32> to vector<2x8x32xf32>
    %c0_9 = arith.constant 0 : index
    %c0_10 = arith.constant 0 : index
    %10 = vector.load %arg3[%c0_9, %c0_10] : memref<32x32xf32, #tpu.memory_space<vmem>>, vector<32x32xf32>
    %cst_11 = arith.constant dense<0.000000e+00> : vector<16x32xf32>
    %11 = tpu.matmul %3, %10, %cst_11 {dimension_numbers = #tpu.dot_dimension_numbers<[1], [0], [0], [1], [0, 0, 1, 1], [], []>} : vector<16x32xf32>, vector<32x32xf32>, vector<16x32xf32> -> vector<16x32xf32>
    %c0_12 = arith.constant 0 : index
    %c0_13 = arith.constant 0 : index
    %12 = vector.load %arg6[%c0_12, %c0_13] : memref<1x32xf32, #tpu.memory_space<vmem>>, vector<1x32xf32>
    %13 = vector.broadcast %12 : vector<1x32xf32> to vector<16x32xf32>
    %14 = arith.addf %11, %13 : vector<16x32xf32>
    %15 = vector.shape_cast %14 : vector<16x32xf32> to vector<2x8x32xf32>
    %c0_14 = arith.constant 0 : index
    %c0_15 = arith.constant 0 : index
    %16 = vector.load %arg4[%c0_14, %c0_15] : memref<32x32xf32, #tpu.memory_space<vmem>>, vector<32x32xf32>
    %cst_16 = arith.constant dense<0.000000e+00> : vector<16x32xf32>
    %17 = tpu.matmul %3, %16, %cst_16 {dimension_numbers = #tpu.dot_dimension_numbers<[1], [0], [0], [1], [0, 0, 1, 1], [], []>} : vector<16x32xf32>, vector<32x32xf32>, vector<16x32xf32> -> vector<16x32xf32>
    %c0_17 = arith.constant 0 : index
    %c0_18 = arith.constant 0 : index
    %18 = vector.load %arg7[%c0_17, %c0_18] : memref<1x32xf32, #tpu.memory_space<vmem>>, vector<1x32xf32>
    %19 = vector.broadcast %18 : vector<1x32xf32> to vector<16x32xf32>
    %20 = arith.addf %17, %19 : vector<16x32xf32>
    %21 = vector.shape_cast %20 : vector<16x32xf32> to vector<2x8x32xf32>
    "tpu.trace_start"() <{level = 10 : i32, message = "bqd,bkd->bqk"}> : () -> ()
    %cst_19 = arith.constant dense<0.000000e+00> : vector<2x8x8xf32>
    %22 = tpu.matmul %9, %15, %cst_19 {dimension_numbers = #tpu.dot_dimension_numbers<[2], [2], [1], [1], [0, 0, 0, 1, 1, 1], [0], [0]>} : vector<2x8x32xf32>, vector<2x8x32xf32>, vector<2x8x8xf32> -> vector<2x8x8xf32>
    "tpu.trace_stop"() : () -> ()
    %cst_20 = arith.constant 0.353553385 : f32
    %23 = vector.broadcast %cst_20 : f32 to vector<2x8x8xf32>
    %24 = arith.mulf %22, %23 : vector<2x8x8xf32>
    %cst_21 = arith.constant dense<0xFF800000> : vector<2x8xf32>
    %25 = vector.multi_reduction <maximumf>, %24, %cst_21 [2] : vector<2x8x8xf32> to vector<2x8xf32>
    %26 = vector.shape_cast %25 : vector<2x8xf32> to vector<2x8x1xf32>
    %27 = vector.broadcast %26 : vector<2x8x1xf32> to vector<2x8x8xf32>
    %28 = arith.subf %24, %27 : vector<2x8x8xf32>
    %29 = math.exp %28 : vector<2x8x8xf32>
    %cst_22 = arith.constant dense<0.000000e+00> : vector<2x8xf32>
    %30 = vector.multi_reduction <add>, %29, %cst_22 [2] : vector<2x8x8xf32> to vector<2x8xf32>
    %31 = vector.shape_cast %30 : vector<2x8xf32> to vector<2x8x1xf32>
    "tpu.trace_start"() <{level = 10 : i32, message = "bqk,bkd->bqd"}> : () -> ()
    %cst_23 = arith.constant dense<0.000000e+00> : vector<2x8x32xf32>
    %32 = tpu.matmul %29, %21, %cst_23 {dimension_numbers = #tpu.dot_dimension_numbers<[2], [1], [1], [2], [0, 0, 0, 1, 1, 2], [0], [0]>} : vector<2x8x8xf32>, vector<2x8x32xf32>, vector<2x8x32xf32> -> vector<2x8x32xf32>
    "tpu.trace_stop"() : () -> ()
    %33 = vector.broadcast %31 : vector<2x8x1xf32> to vector<2x8x32xf32>
    %34 = arith.divf %32, %33 : vector<2x8x32xf32>
    %c0_24 = arith.constant 0 : index
    %c0_25 = arith.constant 0 : index
    %c0_26 = arith.constant 0 : index
    %35 = vector.load %arg8[%c0_24, %c0_25, %c0_26] : memref<2x8x32xf32, #tpu.memory_space<vmem>>, vector<2x8x32xf32>
    tpu.vector_store %arg8[%c0_24, %c0_25, %c0_26], %34 {strides = array<i32>} : memref<2x8x32xf32, #tpu.memory_space<vmem>>, vector<2x8x32xf32>,
    return
  }
}

</mosaic_0001>

<bundles_post_ra>
// kernel: tpu_custom_call.1
= control target key start
LH: loop header
LB: loop body
LE: loop exit
PB: predicated region body
PF: predicated region fallthrough
CT: control target
= control target key end

     0   :  { %13 = vsyncpa [#allocation3], 0  ;;  %s1079_s0 = inlined_call_operand.hbm [shape: f32[2,8,32], index: 0, kind: input, shape index: {}]   ;;  %s1080_s1 = inlined_call_operand.hbm [shape: f32[2,8,32], index: 1, kind: input, shape index: {}]   ;;  %s1081_s2 = inlined_call_operand.hbm [shape: f32[32,32], index: 2, kind: input, shape index: {}]   ;;  %s1082_s3 = inlined_call_operand.hbm [shape: f32[32,32], index: 3, kind: input, shape index: {}]   ;;  %s1083_s4 = inlined_call_operand.hbm [shape: f32[32,32], index: 4, kind: input, shape index: {}]   ;;  %s1084_s5 = inlined_call_operand.vmem [shape: f32[1,32], index: 5, kind: input, shape index: {}]   ;;  %s1085_s6 = inlined_call_operand.vmem [shape: f32[1,32], index: 6, kind: input, shape index: {}]   ;;  %s1086_s7 = inlined_call_operand.vmem [shape: f32[1,32], index: 7, kind: input, shape index: {}]   ;;  %s1087_s8 = inlined_call_operand.hbm [shape: f32[2,8,32], index: 8, kind: output, shape index: {}]  }
   0x1   :  { %14 = vsyncpa [#allocation6], 0 }
   0x2   :  { %15 = vsyncpa [#allocation9], 0 }
   0x3   :  { %16 = vsyncpa [#allocation4], 0  ;;  %s957_s27 = smov [#allocation5]   ;;  %s958_s29 = smov [#allocation8]  }
   0x4   :  { %s34_s28 = sshll.u32 %s957_s27, 4  ;;  %s58_s30 = sshll.u32 %s958_s29, 4  ;;  %s35_s28 = int_to_ptr.vmem [resolvable:$true] %s34_s28  ;;  %s59_s30 = int_to_ptr.vmem [resolvable:$true] %s58_s30 }
   0x5   :  { %s837_s9 = scalar_lea.vmem %s35_s28, 256  ;;  %p842_p1 = scmp.lt.s32.totalorder %s35_s28, %s35_s28 }
   0x6   :  { %p838_p0 = scmp.ne.s32.totalorder %s35_s28, %s837_s9  ;;  %p843_p2 = scmp.lt.s32.totalorder %s837_s9, %s837_s9 }
   0x8   :  { %p844_p3 = por %p843_p2, %p842_p1 }
   0xa   :  { %p845_p4 = pnand %p844_p3, %p838_p0 }
   0xc   :  { %848 = shalt.err (!%p845_p4)
}
   0xd   :  { %s959_s10 = smov 128   ;;  %s960_s11 = smov 8  }
   0xe   :  { %40 = dma.hbm_to_vmem [thread:$0]  %s1080_s1, 256, %s35_s28, [#allocation6], %s959_s10, %s959_s10, %s960_s11  }
   0xf   :  { %s857_s14 = scalar_lea.vmem %s59_s30, 512  ;;  %p862_p6 = scmp.lt.s32.totalorder %s59_s30, %s59_s30 }
  0x10   :  { %p858_p5 = scmp.ne.s32.totalorder %s59_s30, %s857_s14  ;;  %p863_p7 = scmp.lt.s32.totalorder %s857_s14, %s857_s14 }
  0x12   :  { %p864_p8 = por %p863_p7, %p862_p6 }
  0x14   :  { %p865_p9 = pnand %p864_p8, %p858_p5 }
  0x16   :  { %868 = shalt.err (!%p865_p9)
}
  0x17   :  { %64 = dma.hbm_to_vmem [thread:$0]  %s1082_s3, 512, %s59_s30, [#allocation9], %s959_s10, %s959_s10, %s960_s11  }
  0x18   :  { %s961_s17 = smov [#allocation2]   ;;  %s962_s19 = smov [#allocation7]  }
  0x19   :  { %s22_s18 = sshll.u32 %s961_s17, 4  ;;  %s46_s20 = sshll.u32 %s962_s19, 4  ;;  %s23_s18 = int_to_ptr.vmem [resolvable:$true] %s22_s18  ;;  %s47_s20 = int_to_ptr.vmem [resolvable:$true] %s46_s20 }
  0x1a   :  { %s877_s1 = scalar_lea.vmem %s23_s18, 256  ;;  %p882_p11 = scmp.lt.s32.totalorder %s23_s18, %s23_s18 }
  0x1b   :  { %p878_p10 = scmp.ne.s32.totalorder %s23_s18, %s877_s1  ;;  %p883_p12 = scmp.lt.s32.totalorder %s877_s1, %s877_s1 }
  0x1d   :  { %p884_p13 = por %p883_p12, %p882_p11 }
  0x1f   :  { %p885_p0 = pnand %p884_p13, %p878_p10 }
  0x21   :  { %888 = shalt.err (!%p885_p0)
}
  0x22   :  { %28 = dma.hbm_to_vmem [thread:$0]  %s1079_s0, 256, %s23_s18, [#allocation3], %s959_s10, %s959_s10, %s960_s11  }
  0x23   :  { %s897_s3 = scalar_lea.vmem %s47_s20, 512  ;;  %p902_p2 = scmp.lt.s32.totalorder %s47_s20, %s47_s20 }
  0x24   :  { %p898_p1 = scmp.ne.s32.totalorder %s47_s20, %s897_s3  ;;  %p903_p3 = scmp.lt.s32.totalorder %s897_s3, %s897_s3 }
  0x26   :  { %p904_p4 = por %p903_p3, %p902_p2 }
  0x28   :  { %p905_p5 = pnand %p904_p4, %p898_p1 }
  0x2a   :  { %908 = shalt.err (!%p905_p5)
}
  0x2b   :  { %52 = dma.hbm_to_vmem [thread:$0]  %s1081_s2, 512, %s47_s20, [#allocation6], %s959_s10, %s959_s10, %s960_s11  }
  0x2c   :  { %s963_s25 = smov [#allocation10]  }
  0x2d   :  { %s70_s26 = sshll.u32 %s963_s25, 4  ;;  %s71_s26 = int_to_ptr.vmem [resolvable:$true] %s70_s26 }
  0x2e   :  { %s917_s27 = scalar_lea.vmem %s71_s26, 512  ;;  %p922_p7 = scmp.lt.s32.totalorder %s71_s26, %s71_s26 }
  0x2f   :  { %p918_p6 = scmp.ne.s32.totalorder %s71_s26, %s917_s27  ;;  %p923_p8 = scmp.lt.s32.totalorder %s917_s27, %s917_s27 }
  0x31   :  { %p924_p9 = por %p923_p8, %p922_p7 }
  0x33   :  { %p925_p10 = pnand %p924_p9, %p918_p6 }
  0x35   :  { %928 = shalt.err (!%p925_p10)
}
  0x36   :  { %76 = dma.hbm_to_vmem [thread:$0]  %s1083_s4, 512, %s71_s26, [#allocation9], %s959_s10, %s959_s10, %s960_s11  }
  0x37   :  { %949 = dma.done.wait [#allocation3], 256  }
  0x38   :  { %950 = vsyncadd [#allocation3], 4294967040 }
  0x39   :  { %951 = dma.done.wait [#allocation6], 768  }
  0x3a   :  { %952 = vsyncadd [#allocation6], 4294966528 }
  0x3b   :  { %953 = dma.done.wait [#allocation9], 1024  }
  0x3c   :  { %954 = vsyncadd [#allocation9], 4294966272  ;;  %v198_v0 = vld [vmem:[#allocation8 + $0x18] sm:$0xff]  ;;  %v197_v2 = vld [vmem:[#allocation8 + $0x10] sm:$0xff]  ;;  %vm113_vm0 = vcmask 261120   ;;  %v964_v12 = vmov 0.0  }
  0x3d   :  { %v105_v1 = vld [vmem:[#allocation7 + $0x18] sm:$0xff]  ;;  %769 = vmatprep.subr.mxu1 %v198_v0  ;;  %v104_v3 = vld [vmem:[#allocation7 + $0x10] sm:$0xff]  ;;  %v196_v4 = vld [vmem:[#allocation8 + $0x8] sm:$0xff]  ;;  %vm965_vm1 = vmmov 0   ;;  %vm527_vm2 = vcmask 64512  }
  0x3e   :  { %758 = vmatprep.subr.mxu0 %v105_v1  ;;  %770 = vmatpush3.msra.mxu1 %v198_v0  ;;  %v103_v5 = vld [vmem:[#allocation7 + $0x8] sm:$0xff]  ;;  %v195_v6 = vld [vmem:[#allocation8] sm:$0xff]  ;;  %v100_v7 = vld [vmem:[#allocation5] sm:$0xff] }
  0x3f   :  { %759 = vmatpush3.msra.mxu0 %v105_v1  ;;  %771 = vmatprep.subr.mxu1 %v197_v2  ;;  %v102_v8 = vld [vmem:[#allocation7] sm:$0xff]  ;;  %v101_v9 = vld [vmem:[#allocation5 + $0x8] sm:$0xff]  ;;  %v99_v11 = vld [vmem:[#allocation2 + $0x8] sm:$0xff] }
  0x40   :  { %760 = vmatprep.subr.mxu0 %v104_v3  ;;  %772 = vmatpush3.msra.mxu1 %v197_v2  ;;  %v98_v10 = vld [vmem:[#allocation2] sm:$0xff]  ;;  %v290_v13 = vld [vmem:[#allocation10 + $0x18] sm:$0xff]  ;;  %v289_v14 = vld [vmem:[#allocation10 + $0x10] sm:$0xff] }
  0x41   :  { %761 = vmatpush3.msra.mxu0 %v104_v3  ;;  %773 = vmatprep.subr.mxu1 %v196_v4  ;;  %v288_v15 = vld [vmem:[#allocation10 + $0x8] sm:$0xff]  ;;  %v287_v16 = vld [vmem:[#allocation10] sm:$0xff] }
  0x42   :  { %762 = vmatprep.subr.mxu0 %v103_v5  ;;  %774 = vmatpush3.msra.mxu1 %v196_v4  ;;  %v720_v18 = vld [vmem:[%s1085_s6] ss:$0 sm:$0xff] }
  0x43   :  { %763 = vmatpush3.msra.mxu0 %v103_v5  ;;  %775 = vmatprep.subr.mxu1 %v195_v6  ;;  %v717_v21 = vld [vmem:[%s1084_s5] ss:$0 sm:$0xff] }
  0x44   :  { %777 = vmatprep.mubr.msk.f32.mxu1 %vm113_vm0, %v100_v7  ;;  %776 = vmatpush3.msra.mxu1 %v195_v6  ;;  %v723_v36 = vld [vmem:[%s1086_s7] ss:$0 sm:$0xff]  ;;  %s966_s7 = smov [#allocation11]  }
  0x45   :  { %764 = vmatprep.subr.mxu0 %v102_v8  ;;  %778 = vmatmul.mubr.msk.f32.vlgmr.msra.gmra.mxu1 %vm113_vm0, %v101_v9  ;;  %s703_s9 = sshll.u32 %s966_s7, 4  ;;  %s704_s9 = int_to_ptr.vmem [resolvable:$true] %s703_s9 }
  0x46   :  { %765 = vmatpush3.msra.mxu0 %v102_v8  ;;  %766 = vmatprep.mubr.msk.f32.mxu0 %vm113_vm0, %v98_v10  ;;  %s929_s12 = scalar_lea.vmem %s704_s9, 256  ;;  %p934_p12 = scmp.lt.s32.totalorder %s704_s9, %s704_s9 }
  0x47   :  { %767 = vmatmul.mubr.msk.f32.vlgmr.msra.gmra.mxu0 %vm113_vm0, %v99_v11  ;;  %791 = vmatprep.subr.mxu1 %v964_v12  ;;  %p930_p11 = scmp.ne.s32.totalorder %s704_s9, %s929_s12  ;;  %p935_p13 = scmp.lt.s32.totalorder %s929_s12, %s929_s12 }
  0x48   :  { %788 = vmatprep.mubr.msk.f32.mxu0 %vm113_vm0, %v100_v7  ;;  %793 = vmatprep.mubr.msk.f32.mxu1 %vm965_vm1, %v964_v12 }
  0x49   :  { %780 = vmatprep.subr.mxu0 %v290_v13  ;;  %p936_p0 = por %p935_p13, %p934_p12 }
  0x4a   :  { %781 = vmatpush3.msra.mxu0 %v290_v13 }
  0x4b   :  { %782 = vmatprep.subr.mxu0 %v289_v14  ;;  %p937_p1 = pnand %p936_p0, %p930_p11 }
  0x4c   :  { %783 = vmatpush3.msra.mxu0 %v289_v14 }
  0x4d   :  { %784 = vmatprep.subr.mxu0 %v288_v15 }
  0x4e   :  { %785 = vmatpush3.msra.mxu0 %v288_v15 }
  0x4f   :  { %786 = vmatprep.subr.mxu0 %v287_v16 }
  0x50   :  { %787 = vmatpush3.msra.mxu0 %v287_v16 }
  0x51   :  { %789 = vmatmul.mubr.msk.f32.vlgmr.msra.gmra.mxu0 %vm113_vm0, %v101_v9  ;;  %801 = vmatprep.subr.mxu0 %v964_v12 }
  0x52   :  { %803 = vmatprep.mubr.msk.f32.mxu0 %vm965_vm1, %v964_v12 }
 0x105   :  { %v779_v17 = vpop.f32.mrf.mxu1 }
 0x106   :  { %v284_v25 = vadd.f32 %v779_v17, %v720_v18 }
 0x107   :  { %v768_v19 = vpop.f32.mrf.mxu0  ;;  %v278_v20 = vpop.f32.mrf.mxu1 }
 0x108   :  { %v279_v22 = vadd.f32 %v720_v18, %v278_v20  ;;  %v192_v26 = vadd.f32 %v768_v19, %v717_v21 }
 0x109   :  { %v186_v23 = vpop.f32.mrf.mxu0 }
 0x10a   :  { %792 = vmatpush3.xpose.msk.msra.mxu1 %vm113_vm0, %v279_v22  ;;  %v187_v24 = vadd.f32 %v717_v21, %v186_v23 }
 0x10b   :  { %796 = vmatprep.subr.mxu1 %v964_v12 }
 0x10d   :  { %794 = vmatmul.mubr.msk.f32.vlgmr.msra.gmra.mxu1 %vm113_vm0, %v187_v24 }
 0x10e   :  { %797 = vmatpush3.xpose.msk.msra.mxu1 %vm113_vm0, %v284_v25  ;;  %798 = vmatprep.mubr.msk.f32.mxu1 %vm965_vm1, %v964_v12 }
 0x10f   :  { %806 = vmatprep.subr.mxu1 %v964_v12 }
 0x111   :  { %799 = vmatmul.mubr.msk.f32.vlgmr.msra.gmra.mxu1 %vm113_vm0, %v192_v26  ;;  %v790_v35 = vpop.f32.mrf.mxu0 }
 0x112   :  { %808 = vmatprep.mubr.msk.f32.mxu1 %vm965_vm1, %v964_v12  ;;  %v370_v37 = vadd.f32 %v790_v35, %v723_v36 }
 0x113   :  { %v364_v38 = vpop.f32.mrf.mxu0 }
 0x114   :  { %v365_v39 = vadd.f32 %v723_v36, %v364_v38  ;;  %807 = vmatpush3.msra.mxu1 %v370_v37 }
 0x116   :  { %802 = vmatpush3.msra.mxu0 %v365_v39 }
 0x1cd   :  { %v445_v27 = vpop.f32.mrf.mxu1 }
 0x1ce   :  { %v525_v28 = vmul.f32 0.35355338, %v445_v27 }
 0x1cf   :  { %v795_v29 = vpop.f32.mrf.mxu1 }
 0x1d0   :  { %v528_v30 = vsel %vm527_vm2, %v525_v28, -inf }
 0x1d1   :  { %529 = vmax.xlane.f32.xlu0 %v528_v30  ;;  %v521_v31 = vpop.f32.mrf.mxu1 }
 0x1d2   :  { %v526_v32 = vmul.f32 0.35355338, %v521_v31 }
 0x1d3   :  { %v800_v33 = vpop.f32.mrf.mxu1 }
 0x1d4   :  { %v531_v34 = vsel %vm527_vm2, %v526_v32, -inf }
 0x1d5   :  { %532 = vmax.xlane.f32.xlu0 %v531_v34 }
 0x25a   :  { %v530_v40 = vpop.xlane.xlu0 %529 }
 0x25b   :  { %v534_v41 = vsub.f32 %v525_v28, %v530_v40 }
 0x25d   :  { %v536_v42 = vmul.f32 1.442695, %v534_v41 }
 0x25e   :  { %v533_v43 = vpop.xlane.xlu0 %532 }
 0x25f   :  { %821 = vpow2.f32 %v536_v42  ;;  %v535_v44 = vsub.f32 %v526_v32, %v533_v43 }
 0x261   :  { %v538_v45 = vmul.f32 1.442695, %v535_v44 }
 0x263   :  { %823 = vpow2.f32 %v538_v45 }
 0x26c   :  { %v822_v46 = vpop.eup %821 }
 0x26d   :  { %804 = vmatmul.mubr.msk.f32.vlgmr.msra.gmra.mxu0 %vm527_vm2, %v822_v46  ;;  %v540_v47 = vsel %vm527_vm2, %v822_v46, 0.0 }
 0x26e   :  { %541 = vadd.xlane.f32.xlu1 %v540_v47 }
 0x270   :  { %v824_v48 = vpop.eup %823 }
 0x271   :  { %809 = vmatmul.mubr.msk.f32.vlgmr.msra.gmra.mxu1 %vm527_vm2, %v824_v48  ;;  %v543_v49 = vsel %vm527_vm2, %v824_v48, 0.0 }
 0x272   :  { %544 = vadd.xlane.f32.xlu1 %v543_v49 }
 0x2f7   :  { %v542_v50 = vpop.xlane.xlu1 %541 }
 0x2f8   :  { %825 = vrcp.f32 %v542_v50 }
 0x2fb   :  { %v545_v51 = vpop.xlane.xlu1 %544 }
 0x2fc   :  { %827 = vrcp.f32 %v545_v51 }
 0x305   :  { %v826_v52 = vpop.eup %825 }
 0x309   :  { %v828_v56 = vpop.eup %827 }
 0x32d   :  { %v615_v53 = vpop.f32.mrf.mxu0 }
 0x32e   :  { %v693_v54 = vmul.f32 %v826_v52, %v615_v53 }
 0x32f   :  { %v805_v55 = vpop.f32.mrf.mxu0 }
 0x330   :  { %696 = vst.msk [vmem:[#allocation11] sm:$0xff] %vm113_vm0, %v693_v54 }
 0x331   :  { %v688_v57 = vpop.f32.mrf.mxu1 }
 0x332   :  { %v695_v58 = vmul.f32 %v828_v56, %v688_v57 }
 0x333   :  { %v810_v59 = vpop.f32.mrf.mxu1 }
 0x334   :  { %697 = vst.msk [vmem:[#allocation11 + $0x8] sm:$0xff] %vm113_vm0, %v695_v58 }
 0x335   :  { %940 = shalt.err (!%p937_p1)
}
 0x336   :  { %709 = dma.vmem_to_hbm [thread:$0]  %s704_s9, 256, %s1087_s8, [#allocation4], %s959_s10, %s959_s10, %s960_s11  }
 0x337   :  { %955 = dma.done.wait [#allocation4], 256  }
 0x338   :  { %956 = vsyncadd [#allocation4], 4294967040 }
 0x339   :  { %713 = vsyncpa [#allocation3], 1 }
 0x33a   :  { %714 = vsyncpa [#allocation6], 1 }
 0x33b   :  { %715 = vsyncpa [#allocation9], 1 }
 0x33c   :  { %716 = vsyncpa [#allocation4], 1 }

</bundles_post_ra>
